<compile_context>
chip_gen: v7x
topology: tpu7x:2x2x1
jax: 0.10.0
libtpu: 0.0.40
codegen_flags: <defaults>
</compile_context>

<pallas_src>
import functools

import jax
import jax.numpy as jnp
from jax.experimental import pallas as pl
from jax.experimental.pallas import tpu as pltpu


def _rot6d_to_matrix(rot6d):
    """rot6d: (B, 3, 2) -> (B, 3, 3). Gram-Schmidt.

    NOTE: stacks (b1, b2, b3) as columns (axis=-1) -- verify once against the torch
    rot6d_to_matrix convention used by the original Joint_Optimizer (some stack as rows).
    """
    a1 = rot6d[..., 0]
    a2 = rot6d[..., 1]
    b1 = a1 / jnp.maximum(jnp.linalg.norm(a1, axis=-1, keepdims=True), 1e-12)
    b2 = a2 - jnp.sum(b1 * a2, axis=-1, keepdims=True) * b1
    b2 = b2 / jnp.maximum(jnp.linalg.norm(b2, axis=-1, keepdims=True), 1e-12)
    b3 = jnp.cross(b1, b2)
    return jnp.stack([b1, b2, b3], axis=-1)


def _joint_opt_kernel(vog_ref, coef_ref, prevc_ref, verts_out_ref, part_ref, *, num_valid):
    """One grid step = one block of TB frames, sublane-dense (frames on sublanes,
    vertices on lanes).

    vog_ref:       (3, Vp)       lane-dense original vertices (zero-padded lanes >= num_valid)
    coef_ref:      (1, TB, 128)  per-frame coefficients: lanes 0..8 = |s|*R row-major
                                 (idx 3*m + k = R[m, k]), lanes 9..11 = |s|*t, rest zero
    prevc_ref:     (1, 1, 128)   coefficients of the frame preceding this block
                                 (frame 0 for block 0 -> exactly-zero boundary diff)
    verts_out_ref: (3, TB, Vp)   transformed vertices, per-coordinate (TB, Vp) planes
    part_ref:      (1, 1, 128)   per-block partial sum of squared temporal diffs
    """
    tb = verts_out_ref.shape[1]
    vp = vog_ref.shape[1]

    coef = coef_ref[0]          # (TB, 128)
    pc = prevc_ref[0]           # (1, 128)

    vx = vog_ref[0:1, :]        # (1, Vp) -- sublane-broadcast across frames
    vy = vog_ref[1:2, :]
    vz = vog_ref[2:3, :]

    acc = None
    for k in range(3):          # static unroll over xyz coordinates
        # (TB, 1) coefficient columns lane-broadcast; (1, Vp) vertices sublane-broadcast.
        row = (coef[:, k:k + 1] * vx + coef[:, 3 + k:4 + k] * vy
               + coef[:, 6 + k:7 + k] * vz + coef[:, 9 + k:10 + k])        # (TB, Vp)
        verts_out_ref[k] = row.astype(verts_out_ref.dtype)

        # Frame preceding this block, recomputed from its own coefficients (bitwise
        # identical to the row the previous block produced) -> no sequential carry.
        prev_row = (pc[:, k:k + 1] * vx + pc[:, 3 + k:4 + k] * vy
                    + pc[:, 6 + k:7 + k] * vz + pc[:, 9 + k:10 + k])       # (1, Vp)

        prev = jnp.concatenate([prev_row, row[:tb - 1, :]], axis=0)         # (TB, Vp)
        d = row - prev
        dd = d * d
        acc = dd if acc is None else acc + dd

    # Padded vertex lanes carry nonzero translation diffs -> mask once per block, then a
    # single cross-lane reduce. The sum over blocks happens in XLA.
    if num_valid == vp:
        total = jnp.sum(acc)
    else:
        lane = jax.lax.broadcasted_iota(jnp.int32, (1, vp), 1)
        total = jnp.sum(acc * (lane < num_valid).astype(jnp.float32))
    part_ref[...] = jnp.broadcast_to(total, (1, 1, 128))


def _vmem_capacity_bytes():
    """Physical VMEM of the attached TPU; conservative 64 MiB (v7x per-core) fallback."""
    try:
        cap = getattr(pltpu.get_tpu_info(), "vmem_capacity_bytes", None)
        if cap:
            return int(cap)
    except Exception:
        pass
    return 64 * 1024 * 1024


def _block_bytes(tb, vp):
    """Rough per-grid-step VMEM footprint (f32): double-buffered I/O + live temporaries."""
    vog = 2 * 3 * vp * 4                      # shared verts_og (pipeline double-buffers it)
    coefs = 2 * (tb * 128 + 128) * 4          # per-frame + block-boundary coefficients
    outs = 2 * (3 * tb * vp + 128) * 4        # verts block + loss partial
    temps = 5 * tb * vp * 4                   # row / prev / diff / acc live values
    return vog + coefs + outs + temps


def _choose_tb(num_frames, vp, budget_bytes):
    """Largest frames-per-block (multiple of 8) whose working set fits the VMEM budget;
    keeps >= 2 grid steps when there is enough work (feeds both v7x TensorCores)."""
    fixed = _block_bytes(0, vp)
    per_frame = _block_bytes(1, vp) - fixed
    tb_budget = 8 * max(1, (budget_bytes - fixed) // (8 * per_frame))
    tb = min(8 * int(pl.cdiv(num_frames, 8)), int(tb_budget))
    if num_frames >= 16:
        tb = min(tb, 8 * ((num_frames - 1) // 8))   # guarantee NB >= 2
    return max(8, tb)


def verts_to_bv3(verts_lane_dense, num_frames, num_verts):
    """Kernel-native (3, Bp, Vp) -> reference (B, V, 3). Test/compatibility only: this
    transpose re-moves the whole tensor through HBM, so keep it off the hot path."""
    return jnp.transpose(verts_lane_dense[:, :num_frames, :num_verts], (1, 2, 0))


def joint_optimizer_forward(translations_object, rotations_object6d, verts_object_og,
                            int_scales_object, faces_object=None,
                            camintr_rois_object=None, target_masks_object=None,
                            frames_per_block=None, verts_dtype=jnp.float32):
    """Mirrors Joint_Optimizer.forward.

    Returns ((loss_dict, metric_dict), verts_lane_dense), where verts_lane_dense has the
    kernel-native padded layout (3, Bp, Vp). Set verts_dtype=jnp.bfloat16 to halve the
    output HBM traffic if downstream tolerates it (loss accumulation stays f32).
    """
    B = int(translations_object.shape[0])
    V = int(verts_object_og.shape[0])

    # ---- tiny O(B*12) coefficient prep: rot6d -> R, fold |scale| into R and t ----
    R = _rot6d_to_matrix(rotations_object6d).astype(jnp.float32)           # (B, 3, 3)
    t = translations_object.reshape(B, 3).astype(jnp.float32)              # (B, 3)
    s = jnp.abs(int_scales_object.reshape(()).astype(jnp.float32))
    coef12 = jnp.concatenate([(R * s).reshape(B, 9), t * s], axis=-1)      # (B, 12)

    Vp = 128 * int(pl.cdiv(V, 128))
    cap = _vmem_capacity_bytes()
    budget = int(cap * 0.4)                 # leave headroom for Mosaic scratch / pipeline
    if frames_per_block is not None:
        TB = max(8, 8 * int(pl.cdiv(int(frames_per_block), 8)))
        TB = min(TB, 8 * int(pl.cdiv(B, 8)))
    else:
        TB = _choose_tb(B, Vp, budget)
    NB = int(pl.cdiv(B, TB))
    Bp = NB * TB

    # Frame padding repeats the last frame -> padded frames give exactly-zero diffs.
    coef12 = jnp.pad(coef12, ((0, Bp - B), (0, 0)), mode="edge")           # (Bp, 12)
    coef = jnp.zeros((Bp, 128), jnp.float32).at[:, :12].set(coef12).reshape(NB, TB, 128)
    prev_idx = jnp.maximum(jnp.arange(NB) * TB - 1, 0)                     # frame before block i
    prevc = jnp.zeros((NB, 1, 128), jnp.float32).at[:, 0, :12].set(coef12[prev_idx])

    # Lane-dense original vertices (3, Vp), zero padding on the vertex (lane) axis.
    vog_t = jnp.zeros((3, Vp), jnp.float32).at[:, :V].set(
        verts_object_og.astype(jnp.float32).T)

    kernel = functools.partial(_joint_opt_kernel, num_valid=V)
    vmem_limit = int(min(cap * 0.7, 96 * 1024 * 1024))

    verts_pad, partials = pl.pallas_call(
        kernel,
        out_shape=(
            jax.ShapeDtypeStruct((3, Bp, Vp), verts_dtype),       # lane-dense verts
            jax.ShapeDtypeStruct((NB, 1, 128), jnp.float32),      # per-block loss partials
        ),
        grid_spec=pltpu.PrefetchScalarGridSpec(
            num_scalar_prefetch=0,
            grid=(NB,),
            in_specs=[
                pl.BlockSpec((3, Vp), lambda i: (0, 0)),           # shared verts_og
                pl.BlockSpec((1, TB, 128), lambda i: (i, 0, 0)),   # per-frame coefficients
                pl.BlockSpec((1, 1, 128), lambda i: (i, 0, 0)),    # block-boundary coefficients
            ],
            out_specs=[
                pl.BlockSpec((3, TB, Vp), lambda i: (0, i, 0)),
                pl.BlockSpec((1, 1, 128), lambda i: (i, 0, 0)),
            ],
        ),
        compiler_params=pltpu.CompilerParams(
            dimension_semantics=("parallel",),       # no carry between frame blocks
            vmem_limit_bytes=vmem_limit),
    )(vog_t, coef, prevc)

    total = jnp.sum(partials[:, 0, 0])
    if B > 1:
        loss_smooth = total / jnp.float32((B - 1) * V * 3)
    else:
        loss_smooth = jnp.float32(jnp.nan)   # torch.mean over empty diff tensor is NaN

    loss_dict = {"loss_smooth_obj": loss_smooth}
    metric_dict = {}
    # TODO(synk): compute_sil_loss needs a differentiable silhouette rasterizer
    # (neural_renderer over faces/camintr vs. ref/keep masks) -- no clean Pallas equivalent.
    return (loss_dict, metric_dict), verts_pad


def _reference(translations_object, rotations_object6d, verts_object_og, int_scales_object):
    """Pure-JAX reference of get_verts_object + compute_smooth_loss."""
    R = _rot6d_to_matrix(rotations_object6d).astype(jnp.float32)
    vr = jnp.einsum("vm,bmk->bvk", verts_object_og.astype(jnp.float32), R,
                    precision=jax.lax.Precision.HIGHEST)
    verts = jnp.abs(int_scales_object.reshape(())) * (
        vr + translations_object.reshape(-1, 1, 3).astype(jnp.float32))
    loss = jnp.mean((verts[1:] - verts[:-1]) ** 2)
    return loss, verts


if __name__ == "__main__":
    key = jax.random.PRNGKey(0)
    B, V, F, H, W = 20, 200, 96, 16, 16
    k1, k2, k3, k4, k5 = jax.random.split(key, 5)

    verts_object_og = jax.random.normal(k1, (V, 3), jnp.float32)
    translations_object = 0.1 * jax.random.normal(k2, (B, 1, 3), jnp.float32)
    rotations_object6d = jax.random.normal(k3, (B, 3, 2), jnp.float32)   # rot6d params
    int_scales_object = jnp.array([-1.3], jnp.float32)                   # exercises |scale| folding
    faces_object = jax.random.randint(k4, (B, F, 3), 0, V)               # only used by sil loss (TODO)
    camintr_rois_object = jnp.tile(jnp.eye(3, dtype=jnp.float32)[None], (B, 1, 1))
    target_masks_object = (jax.random.uniform(k5, (B, H, W)) > 0.5).astype(jnp.float32)

    ref_loss, ref_verts = _reference(
        translations_object, rotations_object6d, verts_object_og, int_scales_object)

    # Explicit small blocks: exercises multi-block grid, block-boundary diffs, frame padding.
    (loss_dict, metric_dict), verts_pad = joint_optimizer_forward(
        translations_object, rotations_object6d, verts_object_og, int_scales_object,
        faces_object, camintr_rois_object, target_masks_object, frames_per_block=8)
    jax.block_until_ready((loss_dict["loss_smooth_obj"], verts_pad))

    verts = verts_to_bv3(verts_pad, B, V)     # test-only relayout to the reference layout
    assert jnp.allclose(verts, ref_verts, rtol=1e-4, atol=1e-5), "verts mismatch (TB=8)"
    assert jnp.allclose(loss_dict["loss_smooth_obj"], ref_loss, rtol=1e-4, atol=1e-6), \
        "loss mismatch (TB=8)"

    # Auto-tiled path (VMEM-budget TB; NB >= 2 because B >= 16).
    (loss_dict2, _), verts_pad2 = joint_optimizer_forward(
        translations_object, rotations_object6d, verts_object_og, int_scales_object,
        faces_object, camintr_rois_object, target_masks_object)
    jax.block_until_ready((loss_dict2["loss_smooth_obj"], verts_pad2))

    verts2 = verts_to_bv3(verts_pad2, B, V)
    assert jnp.allclose(verts2, ref_verts, rtol=1e-4, atol=1e-5), "verts mismatch (auto TB)"
    assert jnp.allclose(loss_dict2["loss_smooth_obj"], ref_loss, rtol=1e-4, atol=1e-6), \
        "loss mismatch (auto TB)"

    print("KERNEL_OK")
</pallas_src>

<mosaic_0001>
module attributes {stable_mosaic.version = 11 : i64} {
  func.func @_joint_opt_kernel(%arg0: i32, %arg1: memref<3x256xf32, #tpu.memory_space<vmem>>, %arg2: memref<1x8x128xf32, #tpu.memory_space<vmem>>, %arg3: memref<1x1x128xf32, #tpu.memory_space<vmem>>, %arg4: memref<3x8x256xf32, #tpu.memory_space<vmem>>, %arg5: memref<1x1x128xf32, #tpu.memory_space<vmem>>) attributes {dimension_semantics = [#tpu.dimension_semantics<parallel>], iteration_bounds = array<i64: 3>, scalar_prefetch = 0 : i64, scratch_operands = 0 : i64, tpu.core_type = #tpu.core_type<tc>, window_params = [{pipeline_mode = #tpu.pipeline_mode<synchronous>, transform_indices = @transform_0, window_bounds = array<i64: 3, 256>}, {transform_indices = @transform_1, window_bounds = array<i64: 1, 8, 128>}, {transform_indices = @transform_2, window_bounds = array<i64: 1, 1, 128>}, {transform_indices = @transform_3, window_bounds = array<i64: 3, 8, 256>}, {transform_indices = @transform_4, window_bounds = array<i64: 1, 1, 128>}]} {
    %c0 = arith.constant 0 : index
    %c0_0 = arith.constant 0 : index
    %c0_1 = arith.constant 0 : index
    %0 = vector.load %arg2[%c0, %c0_0, %c0_1] : memref<1x8x128xf32, #tpu.memory_space<vmem>>, vector<1x8x128xf32>
    %1 = vector.shape_cast %0 : vector<1x8x128xf32> to vector<8x128xf32>
    %c0_2 = arith.constant 0 : index
    %c0_3 = arith.constant 0 : index
    %c0_4 = arith.constant 0 : index
    %2 = vector.load %arg3[%c0_2, %c0_3, %c0_4] : memref<1x1x128xf32, #tpu.memory_space<vmem>>, vector<1x1x128xf32>
    %3 = vector.shape_cast %2 : vector<1x1x128xf32> to vector<1x128xf32>
    %c0_5 = arith.constant 0 : index
    %c0_6 = arith.constant 0 : index
    %4 = vector.load %arg1[%c0_5, %c0_6] : memref<3x256xf32, #tpu.memory_space<vmem>>, vector<1x256xf32>
    %c1 = arith.constant 1 : index
    %c0_7 = arith.constant 0 : index
    %5 = vector.load %arg1[%c1, %c0_7] : memref<3x256xf32, #tpu.memory_space<vmem>>, vector<1x256xf32>
    %c2 = arith.constant 2 : index
    %c0_8 = arith.constant 0 : index
    %6 = vector.load %arg1[%c2, %c0_8] : memref<3x256xf32, #tpu.memory_space<vmem>>, vector<1x256xf32>
    %7 = vector.extract_strided_slice %1 {offsets = [0, 0], sizes = [8, 1], strides = [1, 1]} : vector<8x128xf32> to vector<8x1xf32>
    %8 = vector.broadcast %7 : vector<8x1xf32> to vector<8x256xf32>
    %9 = vector.broadcast %4 : vector<1x256xf32> to vector<8x256xf32>
    %10 = arith.mulf %8, %9 : vector<8x256xf32>
    %11 = vector.extract_strided_slice %1 {offsets = [0, 3], sizes = [8, 1], strides = [1, 1]} : vector<8x128xf32> to vector<8x1xf32>
    %12 = vector.broadcast %11 : vector<8x1xf32> to vector<8x256xf32>
    %13 = vector.broadcast %5 : vector<1x256xf32> to vector<8x256xf32>
    %14 = arith.mulf %12, %13 : vector<8x256xf32>
    %15 = arith.addf %10, %14 : vector<8x256xf32>
    %16 = vector.extract_strided_slice %1 {offsets = [0, 6], sizes = [8, 1], strides = [1, 1]} : vector<8x128xf32> to vector<8x1xf32>
    %17 = vector.broadcast %16 : vector<8x1xf32> to vector<8x256xf32>
    %18 = vector.broadcast %6 : vector<1x256xf32> to vector<8x256xf32>
    %19 = arith.mulf %17, %18 : vector<8x256xf32>
    %20 = arith.addf %15, %19 : vector<8x256xf32>
    %21 = vector.extract_strided_slice %1 {offsets = [0, 9], sizes = [8, 1], strides = [1, 1]} : vector<8x128xf32> to vector<8x1xf32>
    %22 = vector.broadcast %21 : vector<8x1xf32> to vector<8x256xf32>
    %23 = arith.addf %20, %22 : vector<8x256xf32>
    %c0_9 = arith.constant 0 : index
    %c0_10 = arith.constant 0 : index
    %c0_11 = arith.constant 0 : index
    %24 = vector.load %arg4[%c0_9, %c0_10, %c0_11] : memref<3x8x256xf32, #tpu.memory_space<vmem>>, vector<1x8x256xf32>
    %25 = vector.shape_cast %24 : vector<1x8x256xf32> to vector<8x256xf32>
    %26 = vector.shape_cast %23 : vector<8x256xf32> to vector<1x8x256xf32>
    tpu.vector_store %arg4[%c0_9, %c0_10, %c0_11], %26 {strides = array<i32>} : memref<3x8x256xf32, #tpu.memory_space<vmem>>, vector<1x8x256xf32>,
    %27 = vector.extract_strided_slice %3 {offsets = [0, 0], sizes = [1, 1], strides = [1, 1]} : vector<1x128xf32> to vector<1x1xf32>
    %28 = vector.broadcast %27 : vector<1x1xf32> to vector<1x256xf32>
    %29 = arith.mulf %28, %4 : vector<1x256xf32>
    %30 = vector.extract_strided_slice %3 {offsets = [0, 3], sizes = [1, 1], strides = [1, 1]} : vector<1x128xf32> to vector<1x1xf32>
    %31 = vector.broadcast %30 : vector<1x1xf32> to vector<1x256xf32>
    %32 = arith.mulf %31, %5 : vector<1x256xf32>
    %33 = arith.addf %29, %32 : vector<1x256xf32>
    %34 = vector.extract_strided_slice %3 {offsets = [0, 6], sizes = [1, 1], strides = [1, 1]} : vector<1x128xf32> to vector<1x1xf32>
    %35 = vector.broadcast %34 : vector<1x1xf32> to vector<1x256xf32>
    %36 = arith.mulf %35, %6 : vector<1x256xf32>
    %37 = arith.addf %33, %36 : vector<1x256xf32>
    %38 = vector.extract_strided_slice %3 {offsets = [0, 9], sizes = [1, 1], strides = [1, 1]} : vector<1x128xf32> to vector<1x1xf32>
    %39 = vector.broadcast %38 : vector<1x1xf32> to vector<1x256xf32>
    %40 = arith.addf %37, %39 : vector<1x256xf32>
    %41 = vector.extract_strided_slice %23 {offsets = [0, 0], sizes = [7, 256], strides = [1, 1]} : vector<8x256xf32> to vector<7x256xf32>
    %42 = tpu.concatenate %40, %41 in 0 : vector<1x256xf32>, vector<7x256xf32> -> vector<8x256xf32>
    %43 = arith.subf %23, %42 : vector<8x256xf32>
    %44 = arith.mulf %43, %43 : vector<8x256xf32>
    %45 = vector.extract_strided_slice %1 {offsets = [0, 1], sizes = [8, 1], strides = [1, 1]} : vector<8x128xf32> to vector<8x1xf32>
    %46 = vector.broadcast %45 : vector<8x1xf32> to vector<8x256xf32>
    %47 = vector.broadcast %4 : vector<1x256xf32> to vector<8x256xf32>
    %48 = arith.mulf %46, %47 : vector<8x256xf32>
    %49 = vector.extract_strided_slice %1 {offsets = [0, 4], sizes = [8, 1], strides = [1, 1]} : vector<8x128xf32> to vector<8x1xf32>
    %50 = vector.broadcast %49 : vector<8x1xf32> to vector<8x256xf32>
    %51 = vector.broadcast %5 : vector<1x256xf32> to vector<8x256xf32>
    %52 = arith.mulf %50, %51 : vector<8x256xf32>
    %53 = arith.addf %48, %52 : vector<8x256xf32>
    %54 = vector.extract_strided_slice %1 {offsets = [0, 7], sizes = [8, 1], strides = [1, 1]} : vector<8x128xf32> to vector<8x1xf32>
    %55 = vector.broadcast %54 : vector<8x1xf32> to vector<8x256xf32>
    %56 = vector.broadcast %6 : vector<1x256xf32> to vector<8x256xf32>
    %57 = arith.mulf %55, %56 : vector<8x256xf32>
    %58 = arith.addf %53, %57 : vector<8x256xf32>
    %59 = vector.extract_strided_slice %1 {offsets = [0, 10], sizes = [8, 1], strides = [1, 1]} : vector<8x128xf32> to vector<8x1xf32>
    %60 = vector.broadcast %59 : vector<8x1xf32> to vector<8x256xf32>
    %61 = arith.addf %58, %60 : vector<8x256xf32>
    %c1_12 = arith.constant 1 : index
    %c0_13 = arith.constant 0 : index
    %c0_14 = arith.constant 0 : index
    %62 = vector.load %arg4[%c1_12, %c0_13, %c0_14] : memref<3x8x256xf32, #tpu.memory_space<vmem>>, vector<1x8x256xf32>
    %63 = vector.shape_cast %62 : vector<1x8x256xf32> to vector<8x256xf32>
    %64 = vector.shape_cast %61 : vector<8x256xf32> to vector<1x8x256xf32>
    tpu.vector_store %arg4[%c1_12, %c0_13, %c0_14], %64 {strides = array<i32>} : memref<3x8x256xf32, #tpu.memory_space<vmem>>, vector<1x8x256xf32>,
    %65 = vector.extract_strided_slice %3 {offsets = [0, 1], sizes = [1, 1], strides = [1, 1]} : vector<1x128xf32> to vector<1x1xf32>
    %66 = vector.broadcast %65 : vector<1x1xf32> to vector<1x256xf32>
    %67 = arith.mulf %66, %4 : vector<1x256xf32>
    %68 = vector.extract_strided_slice %3 {offsets = [0, 4], sizes = [1, 1], strides = [1, 1]} : vector<1x128xf32> to vector<1x1xf32>
    %69 = vector.broadcast %68 : vector<1x1xf32> to vector<1x256xf32>
    %70 = arith.mulf %69, %5 : vector<1x256xf32>
    %71 = arith.addf %67, %70 : vector<1x256xf32>
    %72 = vector.extract_strided_slice %3 {offsets = [0, 7], sizes = [1, 1], strides = [1, 1]} : vector<1x128xf32> to vector<1x1xf32>
    %73 = vector.broadcast %72 : vector<1x1xf32> to vector<1x256xf32>
    %74 = arith.mulf %73, %6 : vector<1x256xf32>
    %75 = arith.addf %71, %74 : vector<1x256xf32>
    %76 = vector.extract_strided_slice %3 {offsets = [0, 10], sizes = [1, 1], strides = [1, 1]} : vector<1x128xf32> to vector<1x1xf32>
    %77 = vector.broadcast %76 : vector<1x1xf32> to vector<1x256xf32>
    %78 = arith.addf %75, %77 : vector<1x256xf32>
    %79 = vector.extract_strided_slice %61 {offsets = [0, 0], sizes = [7, 256], strides = [1, 1]} : vector<8x256xf32> to vector<7x256xf32>
    %80 = tpu.concatenate %78, %79 in 0 : vector<1x256xf32>, vector<7x256xf32> -> vector<8x256xf32>
    %81 = arith.subf %61, %80 : vector<8x256xf32>
    %82 = arith.mulf %81, %81 : vector<8x256xf32>
    %83 = arith.addf %44, %82 : vector<8x256xf32>
    %84 = vector.extract_strided_slice %1 {offsets = [0, 2], sizes = [8, 1], strides = [1, 1]} : vector<8x128xf32> to vector<8x1xf32>
    %85 = vector.broadcast %84 : vector<8x1xf32> to vector<8x256xf32>
    %86 = vector.broadcast %4 : vector<1x256xf32> to vector<8x256xf32>
    %87 = arith.mulf %85, %86 : vector<8x256xf32>
    %88 = vector.extract_strided_slice %1 {offsets = [0, 5], sizes = [8, 1], strides = [1, 1]} : vector<8x128xf32> to vector<8x1xf32>
    %89 = vector.broadcast %88 : vector<8x1xf32> to vector<8x256xf32>
    %90 = vector.broadcast %5 : vector<1x256xf32> to vector<8x256xf32>
    %91 = arith.mulf %89, %90 : vector<8x256xf32>
    %92 = arith.addf %87, %91 : vector<8x256xf32>
    %93 = vector.extract_strided_slice %1 {offsets = [0, 8], sizes = [8, 1], strides = [1, 1]} : vector<8x128xf32> to vector<8x1xf32>
    %94 = vector.broadcast %93 : vector<8x1xf32> to vector<8x256xf32>
    %95 = vector.broadcast %6 : vector<1x256xf32> to vector<8x256xf32>
    %96 = arith.mulf %94, %95 : vector<8x256xf32>
    %97 = arith.addf %92, %96 : vector<8x256xf32>
    %98 = vector.extract_strided_slice %1 {offsets = [0, 11], sizes = [8, 1], strides = [1, 1]} : vector<8x128xf32> to vector<8x1xf32>
    %99 = vector.broadcast %98 : vector<8x1xf32> to vector<8x256xf32>
    %100 = arith.addf %97, %99 : vector<8x256xf32>
    %c2_15 = arith.constant 2 : index
    %c0_16 = arith.constant 0 : index
    %c0_17 = arith.constant 0 : index
    %101 = vector.load %arg4[%c2_15, %c0_16, %c0_17] : memref<3x8x256xf32, #tpu.memory_space<vmem>>, vector<1x8x256xf32>
    %102 = vector.shape_cast %101 : vector<1x8x256xf32> to vector<8x256xf32>
    %103 = vector.shape_cast %100 : vector<8x256xf32> to vector<1x8x256xf32>
    tpu.vector_store %arg4[%c2_15, %c0_16, %c0_17], %103 {strides = array<i32>} : memref<3x8x256xf32, #tpu.memory_space<vmem>>, vector<1x8x256xf32>,
    %104 = vector.extract_strided_slice %3 {offsets = [0, 2], sizes = [1, 1], strides = [1, 1]} : vector<1x128xf32> to vector<1x1xf32>
    %105 = vector.broadcast %104 : vector<1x1xf32> to vector<1x256xf32>
    %106 = arith.mulf %105, %4 : vector<1x256xf32>
    %107 = vector.extract_strided_slice %3 {offsets = [0, 5], sizes = [1, 1], strides = [1, 1]} : vector<1x128xf32> to vector<1x1xf32>
    %108 = vector.broadcast %107 : vector<1x1xf32> to vector<1x256xf32>
    %109 = arith.mulf %108, %5 : vector<1x256xf32>
    %110 = arith.addf %106, %109 : vector<1x256xf32>
    %111 = vector.extract_strided_slice %3 {offsets = [0, 8], sizes = [1, 1], strides = [1, 1]} : vector<1x128xf32> to vector<1x1xf32>
    %112 = vector.broadcast %111 : vector<1x1xf32> to vector<1x256xf32>
    %113 = arith.mulf %112, %6 : vector<1x256xf32>
    %114 = arith.addf %110, %113 : vector<1x256xf32>
    %115 = vector.extract_strided_slice %3 {offsets = [0, 11], sizes = [1, 1], strides = [1, 1]} : vector<1x128xf32> to vector<1x1xf32>
    %116 = vector.broadcast %115 : vector<1x1xf32> to vector<1x256xf32>
    %117 = arith.addf %114, %116 : vector<1x256xf32>
    %118 = vector.extract_strided_slice %100 {offsets = [0, 0], sizes = [7, 256], strides = [1, 1]} : vector<8x256xf32> to vector<7x256xf32>
    %119 = tpu.concatenate %117, %118 in 0 : vector<1x256xf32>, vector<7x256xf32> -> vector<8x256xf32>
    %120 = arith.subf %100, %119 : vector<8x256xf32>
    %121 = arith.mulf %120, %120 : vector<8x256xf32>
    %122 = arith.addf %83, %121 : vector<8x256xf32>
    %123 = tpu.iota {dimensions = array<i32: 1>} : vector<1x256xi32>
    %c200_i32 = arith.constant 200 : i32
    %124 = vector.broadcast %c200_i32 : i32 to vector<1x256xi32>
    %125 = arith.cmpi slt, %123, %124 : vector<1x256xi32>
    %126 = arith.extui %125 : vector<1x256xi1> to vector<1x256xi32>
    %127 = arith.sitofp %126 : vector<1x256xi32> to vector<1x256xf32>
    %128 = vector.broadcast %127 : vector<1x256xf32> to vector<8x256xf32>
    %129 = arith.mulf %122, %128 : vector<8x256xf32>
    %130 = vector.shape_cast %129 : vector<8x256xf32> to vector<1x8x256xf32>
    %cst = arith.constant dense<0.000000e+00> : vector<1xf32>
    %131 = vector.multi_reduction <add>, %130, %cst [1, 2] : vector<1x8x256xf32> to vector<1xf32>
    %132 = vector.shape_cast %131 : vector<1xf32> to vector<1x1x1xf32>
    %133 = vector.extract %132[0, 0, 0] : f32 from vector<1x1x1xf32>
    %134 = vector.broadcast %133 : f32 to vector<1x1x128xf32>
    %c0_18 = arith.constant 0 : index
    %c0_19 = arith.constant 0 : index
    %c0_20 = arith.constant 0 : index
    %135 = vector.load %arg5[%c0_18, %c0_19, %c0_20] : memref<1x1x128xf32, #tpu.memory_space<vmem>>, vector<1x1x128xf32>
    tpu.vector_store %arg5[%c0_18, %c0_19, %c0_20], %134 {strides = array<i32>} : memref<1x1x128xf32, #tpu.memory_space<vmem>>, vector<1x1x128xf32>,
    return
  }
  func.func @transform_0(%arg0: i32) -> (i32, i32) {
    %c0_i32 = arith.constant 0 : i32
    %c0_i32_0 = arith.constant 0 : i32
    %c0_i32_1 = arith.constant 0 : i32
    return %c0_i32, %c0_i32_0 : i32, i32
  }
  func.func @transform_1(%arg0: i32) -> (i32, i32, i32) {
    %c0_i32 = arith.constant 0 : i32
    %c0_i32_0 = arith.constant 0 : i32
    %c0_i32_1 = arith.constant 0 : i32
    return %arg0, %c0_i32, %c0_i32_0 : i32, i32, i32
  }
  func.func @transform_2(%arg0: i32) -> (i32, i32, i32) {
    %c0_i32 = arith.constant 0 : i32
    %c0_i32_0 = arith.constant 0 : i32
    %c0_i32_1 = arith.constant 0 : i32
    return %arg0, %c0_i32, %c0_i32_0 : i32, i32, i32
  }
  func.func @transform_3(%arg0: i32) -> (i32, i32, i32) {
    %c0_i32 = arith.constant 0 : i32
    %c0_i32_0 = arith.constant 0 : i32
    %c0_i32_1 = arith.constant 0 : i32
    return %c0_i32, %arg0, %c0_i32_0 : i32, i32, i32
  }
  func.func @transform_4(%arg0: i32) -> (i32, i32, i32) {
    %c0_i32 = arith.constant 0 : i32
    %c0_i32_0 = arith.constant 0 : i32
    %c0_i32_1 = arith.constant 0 : i32
    return %arg0, %c0_i32, %c0_i32_0 : i32, i32, i32
  }
}

</mosaic_0001>

<bundles_post_ra>
// kernel: tpu_custom_call.1
= control target key start
LH: loop header
LB: loop body
LE: loop exit
PB: predicated region body
PF: predicated region fallthrough
CT: control target
= control target key end

     0   :  { %10 = vsyncpa [#allocation3], 0  ;;  %s1421_s0 = inlined_call_operand.hbm [shape: f32[3,256], index: 0, kind: input, shape index: {}]   ;;  %s1422_s1 = inlined_call_operand.hbm [shape: f32[3,8,128], index: 1, kind: input, shape index: {}]   ;;  %s1423_s2 = inlined_call_operand.vmem [shape: f32[3,1,128], index: 2, kind: input, shape index: {}]   ;;  %s1424_s3 = inlined_call_operand.hbm [shape: f32[3,24,256], index: 3, kind: output, shape index: {0}]   ;;  %s1425_s4 = inlined_call_operand.hbm [shape: f32[3,1,128], index: 4, kind: output, shape index: {1}]  }
   0x1   :  { %11 = vsyncpa [#allocation6], 0 }
   0x2   :  { %13 = vsyncpa [#allocation6 + $0x1], 0 }
   0x3   :  { %14 = vsyncpa [#allocation4], 0 }
   0x4   :  { %16 = vsyncpa [#allocation4 + $0x1], 0 }
   0x5   :  { %17 = vsyncpa [#allocation9], 0 }
   0x6   :  { %19 = vsyncpa [#allocation9 + $0x1], 0  ;;  %s1078_s15 = smov 0   ;;  %s1080_s16 = smov 0  }
   0x7   :  { %s1082_s17 = smov 0   ;;  %s1084_s18 = smov 0  }
   0x8 LB: > { %s1099_s19 = sadd.s32 4294967295, %s1031_s18   ;;  %s748_s20 = sadd.s32 4294967294, %s1031_s18   ;;  %s1031_s18 = sphi %s1084_s18, %s1448_s18   ;;  %s1027_s17 = sphi %s1082_s17, %s1447_s17   ;;  %s1023_s16 = sphi %s1080_s16, %s1446_s16   ;;  %s1019_s15 = sphi %s1078_s15, %s1445_s15  }
   0x9   : > { %p66_p0 = scmp.ne.s32.totalorder %s1023_s16, %s1019_s15  ;;  %p1426_p1 = scmp.eq.s32.totalorder %s1099_s19, 0 }
   0xa   : > { %p122_p3 = scmp.eq.s32.totalorder %s748_s20, 2  ;;  %p749_p5 = scmp.ge.s32.totalorder %s1031_s18, 1 }
   0xb   : > { %p1108_p4 = por %p1426_p1, %p66_p0  ;;  %p155_p7 = scmp.lt.s32.totalorder %s1031_s18, 4 }
   0xc   : > { %p1113_p6 = por %p122_p3, %p66_p0  ;;  %s1033_s24 = smov [#allocation2]  }
   0xd   : > { %s1429_s21 = scalar_select %p1108_p4, 1, 0 }
   0xe   : > { %s1430_s22 = scalar_select %p1113_p6, 1, 0 }
   0xf   : > { %p1118_p8 = pnand %p749_p5, %p155_p7  ;;  %s168_s25 = sshll.u32 %s1033_s24, 4  ;;  %s169_s25 = int_to_ptr.vmem [resolvable:$true] %s168_s25 }
  0x10   : > { %s1125_s26 = sadd.s32 1, %s1031_s18   ;;  %s53_s30 = sadd.s32 1, %s1027_s17 }
  0x11   : > { %s1431_s23 = scalar_select %p1118_p8, 1, 0 }
  0x12   : > { %p781_p9 = pneg %p1118_p8  ;;  %s50_s28 = ssub.s32 %s1031_s18, %s1125_s26 }
  0x13   : > { %p1135_p11 = scmp.eq.s32.totalorder %s50_s28, 0  ;;  %s871_s7 = scalar_lea.hbm %s1421_s0, 128 }
  0x14   : > { %p1129_p10 = pnand %p781_p9, %p1426_p1  ;;  %p872_p13 = scmp.ne.s32.totalorder %s1421_s0, %s871_s7 }
  0x15   : > { %s1433_s29 = scalar_select %p1135_p11, 1, 0 }
  0x16   : > { %p873_p0 = pneg %p1129_p10  ;;  %p878_p7 = scmp.lt.u32.totalorder %s871_s7, %s1421_s0 }
  0x18   : > { %p874_p3 = pnand %p873_p0, %p872_p13 }
  0x1a   : > { %p875_p5 = pneg %p874_p3 }
  0x1c   : > { %p880_p9 = pnand %p878_p7, %p875_p5 }
  0x1e   : > { %883 = shalt.err (!%p880_p9)
}
  0x1f   : > { %s884_s12 = scalar_lea.vmem %s169_s25, 128  ;;  %p892_p6 = scmp.lt.s32.totalorder %s169_s25, %s169_s25 }
  0x20   : > { %p885_p1 = scmp.ne.s32.totalorder %s169_s25, %s884_s12  ;;  %p893_p4 = scmp.lt.s32.totalorder %s884_s12, %s884_s12 }
  0x22   : > { %p887_p2 = pnand %p885_p1, %p873_p0  ;;  %p894_p8 = por %p893_p4, %p892_p6 }
  0x24   : > { %p888_p12 = pneg %p887_p2 }
  0x26   : > { %p895_p11 = pnand %p894_p8, %p888_p12 }
  0x28   : > { %898 = shalt.err (!%p895_p11)
}
  0x29   : > { %784 = dma.hbm_to_vmem [thread:$0]  (!%p1129_p10), %s1421_s0, 128, %s169_s25, [#allocation3]  }
  0x2a   : > { %p1434_p1 = scmp.ne.s32.totalorder %s1433_s29, 0  ;;  %p61_p2 = scmp.eq.s32.totalorder %s1031_s18, 0 }
  0x2b   : > { %p1435_p4 = scmp.ne.s32.totalorder %s1027_s17, %s1023_s16  ;;  %p1436_p6 = scmp.eq.s32.totalorder %s1099_s19, 2 }
  0x2c   : > { %s1161_s20 = scalar_select %p1434_p1, %s1027_s17, %s53_s30  }
  0x2d   : > { %p1169_p8 = por %p1436_p6, %p1435_p4  ;;  %p797_p11 = scmp.lt.s32.totalorder %s1031_s18, 3 }
  0x2e   : > { %s179_s27 = sand.u32 1, %s1027_s17   ;;  %p1438_p12 = pmov %p1435_p4 }
  0x2f   : > { %s752_s28 = sshll.u32 %s179_s27, 3  ;;  %s753_s5 = sshll.u32 %s1031_s18, 7 }
  0x30   : > { %p62_p13 = por %p61_p2, %p1438_p12  ;;  %s1182_s25 = scalar_lea.hbm %s1422_s1, %s753_s5 }
  0x31   : > { %s183_s29 = scalar_lea.vmem [#allocation5], %s752_s28  ;;  %s180_s9 = scalar_lea.sflag [#allocation6], %s179_s27 }
  0x32   : > { %s190_s30 = sshll.u32 %s183_s29, 4  ;;  %p1184_p10 = pnand %p797_p11, %p62_p13  ;;  %s1188_s30 = int_to_ptr.vmem [resolvable:$true] %s190_s30 }
  0x33   : > { %s899_s10 = scalar_lea.hbm %s1182_s25, 128  ;;  %s904_s13 = scalar_lea.hbm %s1422_s1, 384 }
  0x34   : > { %p900_p0 = scmp.ne.s32.totalorder %s1182_s25, %s899_s10  ;;  %p901_p3 = pneg %p1184_p10 }
  0x35   : > { %p905_p9 = scmp.lt.u32.totalorder %s1182_s25, %s1422_s1  ;;  %p906_p1 = scmp.lt.u32.totalorder %s904_s13, %s899_s10 }
  0x36   : > { %p902_p5 = pnand %p901_p3, %p900_p0  ;;  %p908_p4 = scmp.lt.u32.totalorder %s899_s10, %s1182_s25 }
  0x37   : > { %p907_p2 = por %p906_p1, %p905_p9 }
  0x38   : > { %p903_p7 = pneg %p902_p5 }
  0x39   : > { %p909_p6 = por %p908_p4, %p907_p2 }
  0x3b   : > { %p910_p11 = pnand %p909_p6, %p903_p7 }
  0x3d   : > { %913 = shalt.err (!%p910_p11)
}
  0x3e   : > { %s914_s27 = scalar_lea.vmem %s1188_s30, 128  ;;  %s1034_s5 = smov [#allocation5]  }
  0x3f   : > { %p915_p12 = scmp.ne.s32.totalorder %s1188_s30, %s914_s27  ;;  %s919_s6 = sshll.u32 %s1034_s5, 4  ;;  %s920_s6 = int_to_ptr.vmem [resolvable:$false] %s919_s6 }
  0x40   : > { %s921_s7 = scalar_lea.vmem %s920_s6, 256  ;;  %p922_p5 = scmp.lt.s32.totalorder %s1188_s30, %s920_s6 }
  0x41   : > { %p917_p13 = pnand %p915_p12, %p901_p3  ;;  %p923_p9 = scmp.lt.s32.totalorder %s921_s7, %s914_s27 }
  0x43   : > { %p918_p0 = pneg %p917_p13  ;;  %p924_p1 = por %p923_p9, %p922_p5 }
  0x45   : > { %p925_p2 = pnand %p924_p1, %p918_p0 }
  0x47   : > { %928 = shalt.err (!%p925_p2)
}
  0x48   : > { %788 = dma.hbm_to_vmem [thread:$0]  (!%p1184_p10), %s1182_s25, 128, %s1188_s30, %s180_s9  }
  0x49   : > { %p1440_p7 = scmp.ne.s32.totalorder %s1431_s23, 0 }
  0x4a   : > { %p1441_p3 = scmp.eq.s32.totalorder (!%p1440_p7), %s1099_s19, 0 }
  0x4b   : > { %205 = sbr.rel (%p1440_p7) target bundleno = 524 (0x20c), region = 32 }
  0x52   : > { %1002 = dma.done.wait (%p1441_p3), [#allocation3], 128   ;;  %p1442_p4 = pmov %p1441_p3 }
  0x53   : > { %s1222_s29 = sand.u32 1, %s1023_s16   ;;  %p1443_p6 = scmp.ne.s32.totalorder %s1429_s21, 0 }
  0x54   : > { %1004 = vsyncadd (%p1442_p4), [#allocation3], 4294967168  ;;  %s756_s10 = sshll.u32 %s1222_s29, 3  ;;  %s212_s8 = scalar_lea.sflag [#allocation6], %s1222_s29 }
  0x55   : > { %s215_s11 = scalar_lea.vmem [#allocation5], %s756_s10 }
  0x56   : > { %1006 = dma.done.wait (%p1443_p6), %s212_s8, 128  }
  0x57   : > { %1008 = vsyncadd (%p1443_p6), %s212_s8, 4294967168  ;;  %p247_p10 = scmp.lt.s32.totalorder %s1099_s19, 2  ;;  %v1035_v0 = vmov 1   ;;  %v1036_v1 = vmov 0   ;;  %v1037_v3 = vmov 4   ;;  %v1038_v4 = vmov 3  }
  0x58   : > { %851 = vset.pattern.permute.xlu1 %v1035_v0  ;;  %849 = vset.pattern.permute.xlu0 %v1036_v1  ;;  %v250_v5 = vld [vmem:[%s215_s11] sm:$0xff]  ;;  %v1039_v6 = vmov 6   ;;  %v1040_v7 = vmov 2   ;;  %v1041_v8 = vmov 7   ;;  %v1042_v9 = vmov 8   ;;  %s768_s21 = smul.u32 48, %s1222_s29 }
  0x59   : > { %s248_s23 = scalar_select %p247_p10, %s1099_s19, 2  ;;  %v1043_v10 = vmov 5   ;;  %v1044_v11 = vmov 10   ;;  %v1045_v12 = vmov 11   ;;  %v1046_v13 = vmov 9  }
  0x5a   : > { %v263_v22 = vlaneseq  ;;  %v1242_v27 = vld [vmem:[#allocation2 + $0x1] ss:$4 sm:$0x3]  ;;  %v252_v31 = vld [vmem:[#allocation2] ss:$4 sm:$0x3] }
  0x5b   : > { %s249_s9 = scalar_lea.vmem %s1423_s2, %s248_s23  ;;  %v1254_v34 = vld [vmem:[#allocation2 + $0x2] ss:$4 sm:$0x3]  ;;  %s1281_s12 = scalar_lea.vmem [#allocation7], %s768_s21  ;;  %vm377_vm0 = vcmask 1040384  }
  0x5c   : > { %v251_v2 = vld [vmem:[%s249_s9] sm:$0x1]  ;;  %v264_v25 = vshrl.u32 %v263_v22, 7  ;;  %s613_s13 = sshll.u32 %s1281_s12, 4  ;;  %s767_s14 = sshll.u32 %s1099_s19, 8  ;;  %s1341_s13 = int_to_ptr.vmem [resolvable:$true] %s613_s13 }
  0x5d   : > { %416 = vperm.xlu1 %851, %v251_v2   ;;  %323 = vperm.xlu0 %849, %v251_v2   ;;  %s1347_s5 = scalar_lea.hbm %s1424_s3, %s767_s14  ;;  %s596_s6 = scalar_lea.sflag [#allocation4], %s1222_s29 }
  0x5e   : > { %v1240_v26 = vsub.s32 1, %v264_v25  ;;  %v1244_v30 = vsub.s32 0, %v264_v25  ;;  %s929_s7 = scalar_lea.vmem %s1341_s13, 768  ;;  %s1048_s10 = smov [#allocation7]  }
  0x5f   : > { %p930_p11 = scmp.ne.s32.totalorder %s1341_s13, %s929_s7  ;;  %s933_s8 = sshll.u32 %s1048_s10, 4  ;;  %s934_s8 = int_to_ptr.vmem [resolvable:$false] %s933_s8 }
  0x60   : > { %v1248_v32 = vrot.slane %v1242_v27, %v1244_v30  ;;  %v1252_v33 = vrot.slane %v1242_v27, %v1240_v26  ;;  %v1257_v35 = vrot.slane %v252_v31, %v1244_v30  ;;  %v1260_v36 = vrot.slane %v252_v31, %v1240_v26  ;;  %s935_s11 = scalar_lea.vmem %s934_s8, 1536  ;;  %p936_p0 = scmp.lt.s32.totalorder %s1341_s13, %s934_s8 }
  0x61   : > { %852 = vset.pattern.permute.xlu1 %v1037_v3  ;;  %850 = vset.pattern.permute.xlu0 %v1038_v4  ;;  %v1264_v37 = vrot.slane %v1254_v34, %v1244_v30  ;;  %v1268_v38 = vrot.slane %v1254_v34, %v1240_v26  ;;  %p931_p12 = pnand %p930_p11, %p1169_p8  ;;  %p937_p5 = scmp.lt.s32.totalorder %s935_s11, %s929_s7 }
  0x62   : > { %425 = vperm.xlu1 %852, %v251_v2   ;;  %332 = vperm.xlu0 %850, %v251_v2  }
  0x63   : > { %p932_p13 = pneg %p931_p12  ;;  %p938_p9 = por %p937_p5, %p936_p0 }
  0x65   : > { %p939_p1 = pnand %p938_p9, %p932_p13 }
  0x66   : > { %853 = vset.pattern.permute.xlu1 %v1036_v1  ;;  %276 = vperm.xlu0 %850, %v250_v5  }
  0x67   : > { %259 = vperm.xlu1 %853, %v250_v5  }
  0x6a   : > { %855 = vset.pattern.permute.xlu0 %v1035_v0 }
  0x6b   : > { %385 = vperm.xlu0 %855, %v250_v5   ;;  %854 = vset.pattern.permute.xlu1 %v1039_v6 }
  0x6c   : > { %342 = vperm.xlu1 %854, %v251_v2  }
  0x6f   : > { %858 = vset.pattern.permute.xlu0 %v1040_v7 }
  0x70   : > { %510 = vperm.xlu0 %858, %v251_v2   ;;  %856 = vset.pattern.permute.xlu1 %v1037_v3 }
  0x71   : > { %391 = vperm.xlu1 %856, %v250_v5  }
  0x74   : > { %861 = vset.pattern.permute.xlu0 %v1041_v8 }
  0x75   : > { %399 = vperm.xlu0 %861, %v250_v5   ;;  %857 = vset.pattern.permute.xlu1 %v1041_v8 }
  0x76   : > { %435 = vperm.xlu1 %857, %v251_v2  }
  0x79   : > { %864 = vset.pattern.permute.xlu0 %v1042_v9 }
  0x7a   : > { %529 = vperm.xlu0 %864, %v251_v2   ;;  %859 = vset.pattern.permute.xlu1 %v1043_v10 }
  0x7b   : > { %519 = vperm.xlu1 %859, %v251_v2  }
  0x7e   : > { %493 = vperm.xlu0 %864, %v250_v5  }
  0x7f   : > { %860 = vset.pattern.permute.xlu1 %v1039_v6 }
  0x80   : > { %295 = vperm.xlu1 %860, %v250_v5  }
  0x82   : > { %868 = vset.pattern.permute.xlu0 %v1044_v11 }
  0x83   : > { %407 = vperm.xlu0 %868, %v250_v5  }
  0x84   : > { %862 = vset.pattern.permute.xlu1 %v1040_v7 }
  0x85   : > { %479 = vperm.xlu1 %862, %v250_v5  }
  0x87   : > { %870 = vset.pattern.permute.xlu0 %v1045_v12 }
  0x89   : > { %863 = vset.pattern.permute.xlu1 %v1043_v10 }
  0x8a   : > { %485 = vperm.xlu1 %863, %v250_v5  }
  0x8e   : > { %865 = vset.pattern.permute.xlu1 %v1046_v13 }
  0x8f   : > { %352 = vperm.xlu1 %865, %v251_v2  }
  0x93   : > { %866 = vset.pattern.permute.xlu1 %v1044_v11 }
  0x94   : > { %445 = vperm.xlu1 %866, %v251_v2  }
  0x98   : > { %867 = vset.pattern.permute.xlu1 %v1046_v13 }
  0x99   : > { %314 = vperm.xlu1 %867, %v250_v5  }
  0x9d   : > { %869 = vset.pattern.permute.xlu1 %v1045_v12 }
  0x9e   : > { %539 = vperm.xlu1 %869, %v251_v2  }
  0xa2   : > { %501 = vperm.xlu1 %869, %v250_v5  }
  0xdc   : > { %v1235_v14 = vpop.permute.xlu1 %416  ;;  %v324_v15 = vpop.permute.xlu0 %323 }
  0xdd   : > { %v329_v58 = vrot.slane %v324_v15, %v1244_v30  ;;  %v422_v61 = vrot.slane %v1235_v14, %v1244_v30 }
  0xdf   : > { %v330_v62 = vmul.f32 %v329_v58, %v252_v31  ;;  %v423_v10 = vmul.f32 %v422_v61, %v252_v31 }
  0xe1   : > { %v426_v16 = vpop.permute.xlu1 %425  ;;  %v333_v17 = vpop.permute.xlu0 %332 }
  0xe2   : > { %v338_v59 = vrot.slane %v333_v17, %v1244_v30  ;;  %v431_v60 = vrot.slane %v426_v16, %v1244_v30 }
  0xe4   : > { %v339_v63 = vmul.f32 %v338_v59, %v1242_v27  ;;  %v432_v3 = vmul.f32 %v431_v60, %v1242_v27 }
  0xe5   : > { %v277_v18 = vpop.permute.xlu0 %276 }
  0xe6   : > { %v260_v19 = vpop.permute.xlu1 %259  ;;  %v290_v4 = vmul.f32 %v1248_v32, %v277_v18  ;;  %v291_v5 = vmul.f32 %v1252_v33, %v277_v18  ;;  %v340_v11 = vadd.f32 %v339_v63, %v330_v62  ;;  %v433_v17 = vadd.f32 %v432_v3, %v423_v10 }
  0xe7   : > { %v273_v6 = vmul.f32 %v1257_v35, %v260_v19  ;;  %v274_v7 = vmul.f32 %v1260_v36, %v260_v19 }
  0xea   : > { %v386_v20 = vpop.permute.xlu0 %385 }
  0xeb   : > { %v343_v21 = vpop.permute.xlu1 %342  ;;  %v388_v41 = vmul.f32 %v386_v20, %v1257_v35  ;;  %v389_v42 = vmul.f32 %v386_v20, %v1260_v36 }
  0xec   : > { %v348_v0 = vrot.slane %v343_v21, %v1244_v30  ;;  %v292_v21 = vadd.f32 %v290_v4, %v273_v6 }
  0xee   : > { %v349_v12 = vmul.f32 %v348_v0, %v1254_v34 }
  0xef   : > { %v1237_v23 = vpop.permute.xlu0 %510 }
  0xf0   : > { %v392_v24 = vpop.permute.xlu1 %391  ;;  %v516_v8 = vrot.slane %v1237_v23, %v1244_v30  ;;  %v293_v23 = vadd.f32 %v291_v5, %v274_v7 }
  0xf1   : > { %v394_v43 = vmul.f32 %v392_v24, %v1248_v32  ;;  %v395_v44 = vmul.f32 %v392_v24, %v1252_v33 }
  0xf2   : > { %v517_v24 = vmul.f32 %v516_v8, %v252_v31 }
  0xf3   : > { %v396_v48 = vadd.f32 %v394_v43, %v388_v41  ;;  %v397_v49 = vadd.f32 %v395_v44, %v389_v42 }
  0xf4   : > { %v400_v28 = vpop.permute.xlu0 %399 }
  0xf5   : > { %v436_v29 = vpop.permute.xlu1 %435  ;;  %v402_v45 = vmul.f32 %v400_v28, %v1264_v37  ;;  %v403_v46 = vmul.f32 %v400_v28, %v1268_v38  ;;  %v350_v28 = vadd.f32 %v349_v12, %v340_v11 }
  0xf6   : > { %v441_v1 = vrot.slane %v436_v29, %v1244_v30 }
  0xf7   : > { %v404_v51 = vadd.f32 %v402_v45, %v396_v48  ;;  %v405_v52 = vadd.f32 %v403_v46, %v397_v49 }
  0xf8   : > { %v442_v13 = vmul.f32 %v441_v1, %v1254_v34 }
  0xf9   : > { %v530_v39 = vpop.permute.xlu0 %529 }
  0xfa   : > { %v520_v40 = vpop.permute.xlu1 %519  ;;  %v535_v18 = vrot.slane %v530_v39, %v1244_v30  ;;  %v443_v29 = vadd.f32 %v442_v13, %v433_v17 }
  0xfb   : > { %v525_v9 = vrot.slane %v520_v40, %v1244_v30 }
  0xfc   : > { %v536_v43 = vmul.f32 %v535_v18, %v1254_v34 }
  0xfd   : > { %v494_v47 = vpop.permute.xlu0 %493  ;;  %v526_v25 = vmul.f32 %v525_v9, %v1242_v27 }
  0xff   : > { %v296_v50 = vpop.permute.xlu1 %295  ;;  %v527_v48 = vadd.f32 %v526_v25, %v517_v24  ;;  %v1047_v24 = vmov 0.0  }
 0x100   : > { %v309_v14 = vmul.f32 %v1264_v37, %v296_v50  ;;  %v310_v15 = vmul.f32 %v1268_v38, %v296_v50 }
 0x101   : > { %v537_v59 = vadd.f32 %v536_v43, %v527_v48 }
 0x102   : > { %v408_v53 = vpop.permute.xlu0 %407  ;;  %v311_v41 = vadd.f32 %v309_v14, %v292_v21  ;;  %v312_v42 = vadd.f32 %v310_v15, %v293_v23 }
 0x103   : > { %v1277_v54 = vadd.f32 %v408_v53, %v404_v51  ;;  %v1279_v55 = vadd.f32 %v408_v53, %v405_v52  ;;  %v497_v51 = vmul.f32 %v494_v47, %v1268_v38 }
 0x104   : > { %v480_v56 = vpop.permute.xlu1 %479 }
 0x105   : > { %757 = vst [vmem:[%s1281_s12 + $0x10] sm:$0xff] %v1277_v54  ;;  %758 = vst [vmem:[%s1281_s12 + $0x18] sm:$0xff] %v1279_v55  ;;  %v482_v31 = vmul.f32 %v480_v56, %v1257_v35  ;;  %v483_v50 = vmul.f32 %v480_v56, %v1260_v36  ;;  %v467_v35 = vrot.slane %v1279_v55, 7  ;;  %v573_v36 = vand.u32 127, %v263_v22 }
 0x106   : > { %v466_v61 = vrot.slane %v1277_v54, 7 }
 0x107   : > { %v574_v7 = vadd.s32 128, %v573_v36 }
 0x109   : > { %v486_v57 = vpop.permute.xlu1 %485  ;;  %vm576_vm1 = vcmp.lt.s32.totalorder %v574_v7, 200 }
 0x10a   : > { %v488_v40 = vmul.f32 %v486_v57, %v1248_v32  ;;  %v489_v39 = vmul.f32 %v486_v57, %v1252_v33  ;;  %v496_v32 = vmul.f32 %v494_v47, %v1264_v37  ;;  %v761_v25 = vsel %vm576_vm1, 1.0, %v1047_v24 }
 0x10c   : > { %v490_v52 = vadd.f32 %v488_v40, %v482_v31  ;;  %v491_v53 = vadd.f32 %v489_v39, %v483_v50 }
 0x10e   : > { %v353_v2 = vpop.permute.xlu1 %352  ;;  %v498_v62 = vadd.f32 %v496_v32, %v490_v52 }
 0x10f   : > { %v358_v19 = vrot.slane %v353_v2, %v1244_v30  ;;  %v499_v2 = vadd.f32 %v497_v51, %v491_v53 }
 0x111   : > { %v359_v44 = vadd.f32 %v358_v19, %v350_v28 }
 0x113   : > { %v446_v16 = vpop.permute.xlu1 %445  ;;  %v368_v33 = vrot.slane %v359_v44, %v1240_v26  ;;  %v364_v37 = vrot.slane %v359_v44, %v1244_v30 }
 0x114   : > { %v451_v20 = vrot.slane %v446_v16, %v1244_v30 }
 0x116   : > { %v452_v45 = vadd.f32 %v451_v20, %v443_v29 }
 0x118   : > { %v315_v46 = vpop.permute.xlu1 %314  ;;  %v461_v57 = vrot.slane %v452_v45, %v1240_v26  ;;  %v457_v38 = vrot.slane %v452_v45, %v1244_v30 }
 0x119   : > { %v317_v49 = vadd.f32 %v315_v46, %v311_v41  ;;  %v318_v27 = vadd.f32 %v315_v46, %v312_v42 }
 0x11a   : > { %v471_v63 = vsel %vm377_vm0, %v461_v57, %v467_v35  ;;  %v470_v6 = vsel %vm377_vm0, %v457_v38, %v466_v61 }
 0x11b   : > { %319 = vst [vmem:[%s1281_s12] sm:$0xff] %v317_v49  ;;  %320 = vst [vmem:[%s1281_s12 + $0x8] sm:$0xff] %v318_v27  ;;  %v374_v34 = vrot.slane %v318_v27, 7  ;;  %v373_v58 = vrot.slane %v317_v49, 7  ;;  %v473_v9 = vsub.f32 %v1279_v55, %v471_v63  ;;  %v472_v15 = vsub.f32 %v1277_v54, %v470_v6 }
 0x11d   : > { %v540_v60 = vpop.permute.xlu1 %539  ;;  %v379_v47 = vsel %vm377_vm0, %v368_v33, %v374_v34  ;;  %v378_v0 = vsel %vm377_vm0, %v364_v37, %v373_v58 }
 0x11e   : > { %v545_v56 = vrot.slane %v540_v60, %v1244_v30  ;;  %v381_v22 = vsub.f32 %v318_v27, %v379_v47  ;;  %v380_v8 = vsub.f32 %v317_v49, %v378_v0 }
 0x120   : > { %v546_v1 = vadd.f32 %v545_v56, %v537_v59  ;;  %v383_v14 = vmul.f32 %v381_v22, %v381_v22  ;;  %v382_v18 = vmul.f32 %v380_v8, %v380_v8 }
 0x121   : > { %v502_v3 = vpop.permute.xlu1 %501 }
 0x122   : > { %v504_v4 = vadd.f32 %v502_v3, %v498_v62  ;;  %v505_v5 = vadd.f32 %v502_v3, %v499_v2  ;;  %v551_v10 = vrot.slane %v546_v1, %v1244_v30  ;;  %v555_v11 = vrot.slane %v546_v1, %v1240_v26 }
 0x123   : > { %v475_v30 = vmul.f32 %v473_v9, %v473_v9  ;;  %v474_v26 = vmul.f32 %v472_v15, %v472_v15 }
 0x124   : > { %759 = vst [vmem:[%s1281_s12 + $0x20] sm:$0xff] %v504_v4  ;;  %760 = vst [vmem:[%s1281_s12 + $0x28] sm:$0xff] %v505_v5  ;;  %v560_v12 = vrot.slane %v504_v4, 7  ;;  %v561_v13 = vrot.slane %v505_v5, 7 }
 0x125   : > { %v477_v21 = vadd.f32 %v475_v30, %v383_v14  ;;  %v476_v54 = vadd.f32 %v474_v26, %v382_v18 }
 0x126   : > { %v564_v16 = vsel %vm377_vm0, %v551_v10, %v560_v12  ;;  %v565_v17 = vsel %vm377_vm0, %v555_v11, %v561_v13 }
 0x127   : > { %v566_v19 = vsub.f32 %v504_v4, %v564_v16  ;;  %v567_v55 = vsub.f32 %v505_v5, %v565_v17 }
 0x129   : > { %v569_v20 = vmul.f32 %v567_v55, %v567_v55  ;;  %v568_v23 = vmul.f32 %v566_v19, %v566_v19 }
 0x12b   : > { %v571_v28 = vadd.f32 %v569_v20, %v477_v21  ;;  %v570_v29 = vadd.f32 %v568_v23, %v476_v54 }
 0x12d   : > { %v582_v40 = vmul.f32 %v761_v25, %v571_v28 }
 0x12f   : > { %v583_v41 = vadd.f32 %v582_v40, %v570_v29 }
 0x131   : > { %584 = vadd.xlane.f32.xlu0 %v583_v41 }
 0x132   : > { %942 = shalt.err (!%p939_p1)
}
 0x133   : > { %s943_s23 = scalar_lea.hbm %s1347_s5, 768  ;;  %s947_s9 = scalar_lea.hbm %s1424_s3, 2304 }
 0x134   : > { %p944_p2 = scmp.ne.s32.totalorder %s1347_s5, %s943_s23  ;;  %p948_p4 = scmp.lt.u32.totalorder %s1347_s5, %s1424_s3 }
 0x135   : > { %p949_p6 = scmp.lt.u32.totalorder %s947_s9, %s943_s23  ;;  %p951_p11 = scmp.lt.u32.totalorder %s943_s23, %s1347_s5 }
 0x136   : > { %p945_p7 = pnand %p944_p2, %p1169_p8 }
 0x137   : > { %p950_p10 = por %p949_p6, %p948_p4 }
 0x138   : > { %p946_p3 = pneg %p945_p7 }
 0x139   : > { %p952_p12 = por %p951_p11, %p950_p10 }
 0x13b   : > { %p953_p13 = pnand %p952_p12, %p946_p3 }
 0x13d   : > { %956 = shalt.err (!%p953_p13)
}
 0x13e   : > { %s1049_s14 = smov 256   ;;  %s1050_s28 = smov 768  }
 0x13f   : > { %s1051_s27 = smov 16   ;;  %s246_s7 = scalar_lea.vmem [#allocation8], %s1222_s29 }
 0x140   : > { %777 = dma.vmem_to_hbm [thread:$0]  (%p1169_p8), %s1341_s13, 768, %s1347_s5, %s596_s6, %s1049_s14, %s1050_s28, %s1051_s27  }
 0x141   : > { %s629_s10 = sshll.u32 %s246_s7, 4  ;;  %s764_s8 = sshll.u32 %s1099_s19, 4  ;;  %s1375_s10 = int_to_ptr.vmem [resolvable:$true] %s629_s10 }
 0x142   : > { %s1380_s6 = scalar_lea.hbm %s1425_s4, %s764_s8  ;;  %s601_s23 = scalar_lea.sflag [#allocation9], %s1222_s29 }
 0x143   : > { %s957_s25 = scalar_lea.vmem %s1375_s10, 16  ;;  %s1052_s19 = smov [#allocation8]  }
 0x144   : > { %p958_p0 = scmp.ne.s32.totalorder %s1375_s10, %s957_s25  ;;  %s961_s30 = sshll.u32 %s1052_s19, 4  ;;  %s962_s30 = int_to_ptr.vmem [resolvable:$false] %s961_s30 }
 0x145   : > { %s963_s9 = scalar_lea.vmem %s962_s30, 32  ;;  %p964_p1 = scmp.lt.s32.totalorder %s1375_s10, %s962_s30 }
 0x146   : > { %p959_p5 = pnand %p958_p0, %p1169_p8  ;;  %p965_p2 = scmp.lt.s32.totalorder %s963_s9, %s957_s25 }
 0x148   : > { %p960_p9 = pneg %p959_p5  ;;  %p966_p7 = por %p965_p2, %p964_p1 }
 0x14a   : > { %p967_p3 = pnand %p966_p7, %p960_p9 }
 0x1be   : > { %v585_v42 = vpop.xlane.xlu0 %584 }
 0x1bf   : > { %v586_v43 = vrot.slane %v585_v42, 4 }
 0x1c1   : > { %v587_v39 = vadd.f32 %v586_v43, %v585_v42 }
 0x1c3   : > { %v588_v44 = vrot.slane %v587_v39, 2 }
 0x1c5   : > { %v589_v45 = vadd.f32 %v588_v44, %v587_v39 }
 0x1c7   : > { %v590_v46 = vrot.slane %v589_v45, 1 }
 0x1c9   : > { %v591_v48 = vadd.f32 %v590_v46, %v589_v45 }
 0x1cb   : > { %769 = vpush %v591_v48 }
 0x1fc   : > { %s770_s11 = spop %769 }
 0x1fd   : > { %v593_v31 = vstv %s770_s11 }
 0x1fe   : > { %594 = vst [vmem:[%s246_s7] sm:$0x1] %v593_v31 }
 0x1ff   : > { %970 = shalt.err (!%p967_p3)
}
 0x200   : > { %s971_s29 = scalar_lea.hbm %s1380_s6, 16  ;;  %s975_s14 = scalar_lea.hbm %s1425_s4, 48 }
 0x201   : > { %p972_p4 = scmp.ne.s32.totalorder %s1380_s6, %s971_s29  ;;  %p976_p11 = scmp.lt.u32.totalorder %s1380_s6, %s1425_s4 }
 0x202   : > { %p977_p12 = scmp.lt.u32.totalorder %s975_s14, %s971_s29  ;;  %p979_p0 = scmp.lt.u32.totalorder %s971_s29, %s1380_s6 }
 0x203   : > { %p973_p6 = pnand %p972_p4, %p1169_p8 }
 0x204   : > { %p978_p13 = por %p977_p12, %p976_p11 }
 0x205   : > { %p974_p10 = pneg %p973_p6 }
 0x206   : > { %p980_p5 = por %p979_p0, %p978_p13 }
 0x208   : > { %p981_p9 = pnand %p980_p5, %p974_p10 }
 0x20a   : > { %984 = shalt.err (!%p981_p9)
}
 0x20b   : > { %778 = dma.vmem_to_hbm [thread:$0]  (%p1169_p8), %s1375_s10, 16, %s1380_s6, %s601_s23  }
 0x20c PF: > { %p799_p1 = scmp.ge.s32.totalorder %s1031_s18, 2  ;;  %s641_s7 = sand.u32 1, %s1019_s15  }
 0x20d   : > { %p1444_p2 = scmp.ne.s32.totalorder %s1430_s22, 0  ;;  %s642_s8 = scalar_lea.sflag [#allocation4], %s641_s7 }
 0x20f   : > { %p790_p7 = pnand %p799_p1, %p1444_p2 }
 0x211   : > { %1010 = dma.done.wait (!%p790_p7), %s642_s8, 768  }
 0x212   : > { %1012 = vsyncadd (!%p790_p7), %s642_s8, 4294966528  ;;  %s651_s11 = scalar_lea.sflag [#allocation9], %s641_s7 }
 0x213   : > { %1014 = dma.done.wait (!%p790_p7), %s651_s11, 16  }
 0x214   : > { %1016 = vsyncadd (!%p790_p7), %s651_s11, 4294967280  ;;  %p22_p8 = scmp.ge.s32.totalorder %s1125_s26, 5   ;;  %s1445_s15 = smov %s1023_s16 }
 0x215   : > { %s1446_s16 = smov %s1027_s17  ;;  %s1447_s17 = smov %s1161_s20 }
 0x216   : > { %s1448_s18 = smov %s1125_s26  ;;  %24 = sbr.rel (!%p22_p8) target bundleno = 8 (0x8), region = 106 }
 0x21d   :  { %655 = vsyncpa [#allocation3], 1 }
 0x21e   :  { %657 = vsyncpa [#allocation3 + $0x1], 1 }
 0x21f   :  { %658 = vsyncpa [#allocation6], 1 }
 0x220   :  { %660 = vsyncpa [#allocation6 + $0x1], 1 }
 0x221   :  { %661 = vsyncpa [#allocation4], 1 }
 0x222   :  { %663 = vsyncpa [#allocation4 + $0x1], 1 }
 0x223   :  { %664 = vsyncpa [#allocation9], 1 }
 0x224   :  { %666 = vsyncpa [#allocation9 + $0x1], 1 }

</bundles_post_ra>
